<compile_context>
chip_gen: v6e
topology: v6e:2x2x1
jax: 0.10.0
libtpu: 0.0.40
codegen_flags: <defaults>
</compile_context>

<pallas_src>
import jax
import jax.numpy as jnp
from jax.experimental import pallas as pl
from jax.experimental.pallas import tpu as pltpu

EPS = 1e-5  # torch.nn.LayerNorm default


def _round_up(n, m):
    return ((n + m - 1) // m) * m


def residual_block_kernel(x_ref, w1_ref, b1_ref, w2_ref, b2_ref, g_ref, beta_ref, o_ref):
    # Everything computed in f32 (matches PyTorch default dtype).
    x = x_ref[...]

    # Linear 1 (MXU): x @ W1 + b1   (W1 already transposed to [in_dim, out_dim]).
    h = jnp.dot(x, w1_ref[...], preferred_element_type=jnp.float32) + b1_ref[...]

    # LayerNorm over the feature dim -- one-pass statistics:
    #   mean = E[h], var = E[h^2] - E[h]^2  (single elementwise traversal of h).
    inv_d = 1.0 / h.shape[-1]
    mean = jnp.sum(h, axis=-1, keepdims=True) * inv_d
    mean_sq = jnp.sum(h * h, axis=-1, keepdims=True) * inv_d
    var = mean_sq - mean * mean
    h_norm = (h - mean) * jax.lax.rsqrt(var + EPS)
    h_norm = h_norm * g_ref[...] + beta_ref[...]

    # SiLU: z * sigmoid(z). sigmoid(z) = 0.5*tanh(z/2) + 0.5 keeps the transcendental
    # on the EUP slot and avoids the f32 divide (VALU reciprocal + Newton iterations).
    act = h_norm * (0.5 * jnp.tanh(0.5 * h_norm) + 0.5)

    # Linear 2 (MXU): act @ W2 + b2.
    y = jnp.dot(act, w2_ref[...], preferred_element_type=jnp.float32) + b2_ref[...]

    # Residual add.
    o_ref[...] = (x + y).astype(o_ref.dtype)


def residual_block(x, w1, b1, w2, b2, gamma, beta, *, tile_b=None):
    """x: [B, D]; w1, w2: [D, D] (already transposed); b1, b2, gamma, beta: [1, D]."""
    B, D = x.shape

    # ---- Batch tile selection -----------------------------------------------------
    # Large tiles amortize per-grid-step overhead and reach the HBM roofline
    # (measured ~85% at >=512 rows vs ~30% at 128). 512 is also a multiple of 128
    # (maps cleanly onto the 128-wide MXU arrays, incl. v5e's 4x128x128).
    if tile_b is None:
        tile_b = min(512, _round_up(B, 8))
    assert tile_b % 8 == 0, "tile_b must be a multiple of 8 (f32 sublane granularity)"

    # Pad ragged batch up to a multiple of tile_b; padded rows are dropped afterwards.
    b_pad = _round_up(B, tile_b)
    x_in = jnp.pad(x, ((0, b_pad - B), (0, 0))) if b_pad != B else x
    grid = (b_pad // tile_b,)

    # ---- Explicit VMEM budget -----------------------------------------------------
    # Resident weights (counted double-buffered to be safe), vectors, double-buffered
    # x/out tiles, and intermediate (tile_b, D) activations + headroom. Cap below
    # v7x's 64 MiB per-TC VMEM; floor at 16 MiB so the scoped default never bites.
    dt = 4  # f32 bytes
    weight_bytes = 2 * (2 * D * D * dt)        # W1, W2
    vec_bytes = 2 * (4 * D * dt)               # b1, b2, gamma, beta
    io_bytes = 2 * (2 * tile_b * D * dt)       # x tile + out tile
    interm_bytes = 4 * tile_b * D * dt         # h / act / temporaries
    vmem_limit = int(1.25 * (weight_bytes + vec_bytes + io_bytes + interm_bytes)) + (4 << 20)
    vmem_limit = max(vmem_limit, 16 << 20)
    vmem_limit = min(vmem_limit, 60 << 20)

    # NOTE: for very large D on v7x (64 MiB/TC), add pipeline_mode=pl.Buffered(1) to the
    # constant-index_map weight/bias specs below to single-buffer the resident weights.
    out = pl.pallas_call(
        residual_block_kernel,
        out_shape=jax.ShapeDtypeStruct((b_pad, D), x.dtype),
        grid_spec=pltpu.PrefetchScalarGridSpec(
            num_scalar_prefetch=0,
            grid=grid,
            in_specs=[
                pl.BlockSpec((tile_b, D), lambda i: (i, 0)),   # x tile
                pl.BlockSpec((D, D), lambda i: (0, 0)),        # W1 (resident)
                pl.BlockSpec((1, D), lambda i: (0, 0)),        # b1
                pl.BlockSpec((D, D), lambda i: (0, 0)),        # W2 (resident)
                pl.BlockSpec((1, D), lambda i: (0, 0)),        # b2
                pl.BlockSpec((1, D), lambda i: (0, 0)),        # ln gamma
                pl.BlockSpec((1, D), lambda i: (0, 0)),        # ln beta
            ],
            out_specs=pl.BlockSpec((tile_b, D), lambda i: (i, 0)),
        ),
        compiler_params=pltpu.CompilerParams(
            dimension_semantics=("parallel",),   # batch tiles shard across TCs (v7x megacore)
            vmem_limit_bytes=vmem_limit,
        ),
    )(x_in, w1, b1, w2, b2, gamma, beta)

    return out[:B] if b_pad != B else out


def residual_block_ref(x, w1, b1, w2, b2, gamma, beta):
    h = x @ w1 + b1
    mean = h.mean(-1, keepdims=True)
    var = ((h - mean) ** 2).mean(-1, keepdims=True)
    h = (h - mean) / jnp.sqrt(var + EPS) * gamma + beta
    h = h * jax.nn.sigmoid(h)
    y = h @ w2 + b2
    return x + y


if __name__ == "__main__":
    # Small demo shapes; residual requires in_dim == out_dim. B is deliberately NOT a
    # multiple of the tile to exercise the ragged-batch padding path.
    B, D = 50, 128
    key = jax.random.PRNGKey(0)
    kx, k1, kb1, k2, kb2 = jax.random.split(key, 5)

    x = jax.random.normal(kx, (B, D), dtype=jnp.float32)
    # Deterministic "PyTorch-like" init (uniform scaled by fan_in), stored transposed.
    bound = 1.0 / (D ** 0.5)
    w1 = jax.random.uniform(k1, (D, D), jnp.float32, -bound, bound)   # [in_dim, out_dim]
    b1 = jax.random.uniform(kb1, (1, D), jnp.float32, -bound, bound)
    w2 = jax.random.uniform(k2, (D, D), jnp.float32, -bound, bound)   # [out_dim, out_dim]
    b2 = jax.random.uniform(kb2, (1, D), jnp.float32, -bound, bound)
    gamma = jnp.ones((1, D), jnp.float32)   # nn.LayerNorm default affine init
    beta = jnp.zeros((1, D), jnp.float32)

    out = residual_block(x, w1, b1, w2, b2, gamma, beta)
    out = jax.block_until_ready(out)

    ref = residual_block_ref(x, w1, b1, w2, b2, gamma, beta)
    assert out.shape == (B, D)
    # Tolerance slightly relaxed vs 1e-5: one-pass variance and the tanh-form sigmoid
    # are mathematically equivalent but not bit-identical to the two-pass/exp reference.
    assert jnp.allclose(out, ref, atol=1e-4, rtol=1e-4), float(jnp.max(jnp.abs(out - ref)))
    print("KERNEL_OK")
</pallas_src>

<mosaic_0001>
module attributes {stable_mosaic.version = 11 : i64} {
  func.func @residual_block_kernel(%arg0: i32, %arg1: memref<56x128xf32, #tpu.memory_space<vmem>>, %arg2: memref<128x128xf32, #tpu.memory_space<vmem>>, %arg3: memref<1x128xf32, #tpu.memory_space<vmem>>, %arg4: memref<128x128xf32, #tpu.memory_space<vmem>>, %arg5: memref<1x128xf32, #tpu.memory_space<vmem>>, %arg6: memref<1x128xf32, #tpu.memory_space<vmem>>, %arg7: memref<1x128xf32, #tpu.memory_space<vmem>>, %arg8: memref<56x128xf32, #tpu.memory_space<vmem>>) attributes {dimension_semantics = [#tpu.dimension_semantics<parallel>], iteration_bounds = array<i64: 1>, scalar_prefetch = 0 : i64, scratch_operands = 0 : i64, tpu.core_type = #tpu.core_type<tc>, window_params = [{transform_indices = @transform_0, window_bounds = array<i64: 56, 128>}, {pipeline_mode = #tpu.pipeline_mode<synchronous>, transform_indices = @transform_1, window_bounds = array<i64: 128, 128>}, {pipeline_mode = #tpu.pipeline_mode<synchronous>, transform_indices = @transform_2, window_bounds = array<i64: 1, 128>}, {pipeline_mode = #tpu.pipeline_mode<synchronous>, transform_indices = @transform_3, window_bounds = array<i64: 128, 128>}, {pipeline_mode = #tpu.pipeline_mode<synchronous>, transform_indices = @transform_4, window_bounds = array<i64: 1, 128>}, {pipeline_mode = #tpu.pipeline_mode<synchronous>, transform_indices = @transform_5, window_bounds = array<i64: 1, 128>}, {pipeline_mode = #tpu.pipeline_mode<synchronous>, transform_indices = @transform_6, window_bounds = array<i64: 1, 128>}, {transform_indices = @transform_7, window_bounds = array<i64: 56, 128>}]} {
    %c0 = arith.constant 0 : index
    %c0_0 = arith.constant 0 : index
    %0 = vector.load %arg1[%c0, %c0_0] : memref<56x128xf32, #tpu.memory_space<vmem>>, vector<56x128xf32>
    %c0_1 = arith.constant 0 : index
    %c0_2 = arith.constant 0 : index
    %1 = vector.load %arg2[%c0_1, %c0_2] : memref<128x128xf32, #tpu.memory_space<vmem>>, vector<128x128xf32>
    %cst = arith.constant dense<0.000000e+00> : vector<56x128xf32>
    %2 = tpu.matmul %0, %1, %cst {dimension_numbers = #tpu.dot_dimension_numbers<[1], [0], [0], [1], [0, 0, 1, 1], [], []>} : vector<56x128xf32>, vector<128x128xf32>, vector<56x128xf32> -> vector<56x128xf32>
    %c0_3 = arith.constant 0 : index
    %c0_4 = arith.constant 0 : index
    %3 = vector.load %arg3[%c0_3, %c0_4] : memref<1x128xf32, #tpu.memory_space<vmem>>, vector<1x128xf32>
    %4 = vector.broadcast %3 : vector<1x128xf32> to vector<56x128xf32>
    %5 = arith.addf %2, %4 : vector<56x128xf32>
    %cst_5 = arith.constant dense<0.000000e+00> : vector<56xf32>
    %6 = vector.multi_reduction <add>, %5, %cst_5 [1] : vector<56x128xf32> to vector<56xf32>
    %7 = vector.shape_cast %6 : vector<56xf32> to vector<56x1xf32>
    %cst_6 = arith.constant 7.812500e-03 : f32
    %8 = vector.broadcast %cst_6 : f32 to vector<56x1xf32>
    %9 = arith.mulf %7, %8 : vector<56x1xf32>
    %10 = arith.mulf %5, %5 : vector<56x128xf32>
    %cst_7 = arith.constant dense<0.000000e+00> : vector<56xf32>
    %11 = vector.multi_reduction <add>, %10, %cst_7 [1] : vector<56x128xf32> to vector<56xf32>
    %12 = vector.shape_cast %11 : vector<56xf32> to vector<56x1xf32>
    %cst_8 = arith.constant 7.812500e-03 : f32
    %13 = vector.broadcast %cst_8 : f32 to vector<56x1xf32>
    %14 = arith.mulf %12, %13 : vector<56x1xf32>
    %15 = arith.mulf %9, %9 : vector<56x1xf32>
    %16 = arith.subf %14, %15 : vector<56x1xf32>
    %17 = vector.broadcast %9 : vector<56x1xf32> to vector<56x128xf32>
    %18 = arith.subf %5, %17 : vector<56x128xf32>
    %cst_9 = arith.constant 9.99999974E-6 : f32
    %19 = vector.broadcast %cst_9 : f32 to vector<56x1xf32>
    %20 = arith.addf %16, %19 : vector<56x1xf32>
    %21 = math.rsqrt %20 : vector<56x1xf32>
    %22 = vector.broadcast %21 : vector<56x1xf32> to vector<56x128xf32>
    %23 = arith.mulf %18, %22 : vector<56x128xf32>
    %c0_10 = arith.constant 0 : index
    %c0_11 = arith.constant 0 : index
    %24 = vector.load %arg6[%c0_10, %c0_11] : memref<1x128xf32, #tpu.memory_space<vmem>>, vector<1x128xf32>
    %25 = vector.broadcast %24 : vector<1x128xf32> to vector<56x128xf32>
    %26 = arith.mulf %23, %25 : vector<56x128xf32>
    %c0_12 = arith.constant 0 : index
    %c0_13 = arith.constant 0 : index
    %27 = vector.load %arg7[%c0_12, %c0_13] : memref<1x128xf32, #tpu.memory_space<vmem>>, vector<1x128xf32>
    %28 = vector.broadcast %27 : vector<1x128xf32> to vector<56x128xf32>
    %29 = arith.addf %26, %28 : vector<56x128xf32>
    %cst_14 = arith.constant 5.000000e-01 : f32
    %30 = vector.broadcast %cst_14 : f32 to vector<56x128xf32>
    %31 = arith.mulf %30, %29 : vector<56x128xf32>
    %32 = math.tanh %31 : vector<56x128xf32>
    %cst_15 = arith.constant 5.000000e-01 : f32
    %33 = vector.broadcast %cst_15 : f32 to vector<56x128xf32>
    %34 = arith.mulf %33, %32 : vector<56x128xf32>
    %cst_16 = arith.constant 5.000000e-01 : f32
    %35 = vector.broadcast %cst_16 : f32 to vector<56x128xf32>
    %36 = arith.addf %34, %35 : vector<56x128xf32>
    %37 = arith.mulf %29, %36 : vector<56x128xf32>
    %c0_17 = arith.constant 0 : index
    %c0_18 = arith.constant 0 : index
    %38 = vector.load %arg4[%c0_17, %c0_18] : memref<128x128xf32, #tpu.memory_space<vmem>>, vector<128x128xf32>
    %cst_19 = arith.constant dense<0.000000e+00> : vector<56x128xf32>
    %39 = tpu.matmul %37, %38, %cst_19 {dimension_numbers = #tpu.dot_dimension_numbers<[1], [0], [0], [1], [0, 0, 1, 1], [], []>} : vector<56x128xf32>, vector<128x128xf32>, vector<56x128xf32> -> vector<56x128xf32>
    %c0_20 = arith.constant 0 : index
    %c0_21 = arith.constant 0 : index
    %40 = vector.load %arg5[%c0_20, %c0_21] : memref<1x128xf32, #tpu.memory_space<vmem>>, vector<1x128xf32>
    %41 = vector.broadcast %40 : vector<1x128xf32> to vector<56x128xf32>
    %42 = arith.addf %39, %41 : vector<56x128xf32>
    %43 = arith.addf %0, %42 : vector<56x128xf32>
    %c0_22 = arith.constant 0 : index
    %c0_23 = arith.constant 0 : index
    %44 = vector.load %arg8[%c0_22, %c0_23] : memref<56x128xf32, #tpu.memory_space<vmem>>, vector<56x128xf32>
    tpu.vector_store %arg8[%c0_22, %c0_23], %43 {strides = array<i32>} : memref<56x128xf32, #tpu.memory_space<vmem>>, vector<56x128xf32>,
    return
  }
  func.func @transform_0(%arg0: i32) -> (i32, i32) {
    %c0_i32 = arith.constant 0 : i32
    %c0_i32_0 = arith.constant 0 : i32
    return %arg0, %c0_i32 : i32, i32
  }
  func.func @transform_1(%arg0: i32) -> (i32, i32) {
    %c0_i32 = arith.constant 0 : i32
    %c0_i32_0 = arith.constant 0 : i32
    %c0_i32_1 = arith.constant 0 : i32
    return %c0_i32, %c0_i32_0 : i32, i32
  }
  func.func @transform_2(%arg0: i32) -> (i32, i32) {
    %c0_i32 = arith.constant 0 : i32
    %c0_i32_0 = arith.constant 0 : i32
    %c0_i32_1 = arith.constant 0 : i32
    return %c0_i32, %c0_i32_0 : i32, i32
  }
  func.func @transform_3(%arg0: i32) -> (i32, i32) {
    %c0_i32 = arith.constant 0 : i32
    %c0_i32_0 = arith.constant 0 : i32
    %c0_i32_1 = arith.constant 0 : i32
    return %c0_i32, %c0_i32_0 : i32, i32
  }
  func.func @transform_4(%arg0: i32) -> (i32, i32) {
    %c0_i32 = arith.constant 0 : i32
    %c0_i32_0 = arith.constant 0 : i32
    %c0_i32_1 = arith.constant 0 : i32
    return %c0_i32, %c0_i32_0 : i32, i32
  }
  func.func @transform_5(%arg0: i32) -> (i32, i32) {
    %c0_i32 = arith.constant 0 : i32
    %c0_i32_0 = arith.constant 0 : i32
    %c0_i32_1 = arith.constant 0 : i32
    return %c0_i32, %c0_i32_0 : i32, i32
  }
  func.func @transform_6(%arg0: i32) -> (i32, i32) {
    %c0_i32 = arith.constant 0 : i32
    %c0_i32_0 = arith.constant 0 : i32
    %c0_i32_1 = arith.constant 0 : i32
    return %c0_i32, %c0_i32_0 : i32, i32
  }
  func.func @transform_7(%arg0: i32) -> (i32, i32) {
    %c0_i32 = arith.constant 0 : i32
    %c0_i32_0 = arith.constant 0 : i32
    return %arg0, %c0_i32 : i32, i32
  }
}

</mosaic_0001>

<bundles_post_ra>
// kernel: tpu_custom_call.1
= control target key start
LH: loop header
LB: loop body
LE: loop exit
PB: predicated region body
PF: predicated region fallthrough
CT: control target
= control target key end

     0   :  { %12 = vsyncpa [#allocation3], 0  ;;  %s999_s0 = inlined_call_operand.hbm [shape: f32[56,128], index: 0, kind: input, shape index: {}]   ;;  %s1000_s1 = inlined_call_operand.hbm [shape: f32[128,128], index: 1, kind: input, shape index: {}]   ;;  %s1001_s2 = inlined_call_operand.vmem [shape: f32[1,128], index: 2, kind: input, shape index: {}]   ;;  %s1002_s3 = inlined_call_operand.hbm [shape: f32[128,128], index: 3, kind: input, shape index: {}]   ;;  %s1003_s4 = inlined_call_operand.vmem [shape: f32[1,128], index: 4, kind: input, shape index: {}]   ;;  %s1004_s5 = inlined_call_operand.vmem [shape: f32[1,128], index: 5, kind: input, shape index: {}]   ;;  %s1005_s6 = inlined_call_operand.vmem [shape: f32[1,128], index: 6, kind: input, shape index: {}]   ;;  %s1006_s7 = inlined_call_operand.hbm [shape: f32[56,128], index: 7, kind: output, shape index: {}]  }
   0x1   :  { %13 = vsyncpa [#allocation6], 0 }
   0x2   :  { %14 = vsyncpa [#allocation4], 0  ;;  %s785_s24 = smov [#allocation5]   ;;  %s786_s26 = smov [#allocation2]  }
   0x3   :  { %s32_s25 = sshll.u32 %s785_s24, 4  ;;  %s20_s27 = sshll.u32 %s786_s26, 4  ;;  %s33_s25 = int_to_ptr.vmem [resolvable:$true] %s32_s25  ;;  %s21_s27 = int_to_ptr.vmem [resolvable:$true] %s20_s27 }
   0x4   :  { %s707_s28 = scalar_lea.vmem %s33_s25, 2048  ;;  %p712_p1 = scmp.lt.s32.totalorder %s33_s25, %s33_s25 }
   0x5   :  { %p708_p0 = scmp.ne.s32.totalorder %s33_s25, %s707_s28  ;;  %p713_p2 = scmp.lt.s32.totalorder %s707_s28, %s707_s28 }
   0x7   :  { %p714_p3 = por %p713_p2, %p712_p1 }
   0x9   :  { %p715_p4 = pnand %p714_p3, %p708_p0 }
   0xb   :  { %718 = shalt.err (!%p715_p4)
}
   0xc   :  { %s787_s29 = smov 128   ;;  %s788_s30 = smov 8  }
   0xd   :  { %38 = dma.hbm_to_vmem [thread:$0]  %s1000_s1, 2048, %s33_s25, [#allocation6], %s787_s29, %s787_s29, %s788_s30  }
   0xe   :  { %s727_s10 = scalar_lea.vmem %s21_s27, 896  ;;  %p732_p6 = scmp.lt.s32.totalorder %s21_s27, %s21_s27 }
   0xf   :  { %p728_p5 = scmp.ne.s32.totalorder %s21_s27, %s727_s10  ;;  %p733_p7 = scmp.lt.s32.totalorder %s727_s10, %s727_s10 }
  0x11   :  { %p734_p8 = por %p733_p7, %p732_p6 }
  0x13   :  { %p735_p9 = pnand %p734_p8, %p728_p5 }
  0x15   :  { %738 = shalt.err (!%p735_p9)
}
  0x16   :  { %26 = dma.hbm_to_vmem [thread:$0]  %s999_s0, 896, %s21_s27, [#allocation3], %s787_s29, %s787_s29, %s788_s30  }
  0x17   :  { %s789_s13 = smov [#allocation7]  }
  0x18   :  { %s46_s14 = sshll.u32 %s789_s13, 4  ;;  %s47_s14 = int_to_ptr.vmem [resolvable:$true] %s46_s14 }
  0x19   :  { %s747_s15 = scalar_lea.vmem %s47_s14, 2048  ;;  %p752_p11 = scmp.lt.s32.totalorder %s47_s14, %s47_s14 }
  0x1a   :  { %p748_p10 = scmp.ne.s32.totalorder %s47_s14, %s747_s15  ;;  %p753_p12 = scmp.lt.s32.totalorder %s747_s15, %s747_s15 }
  0x1c   :  { %p754_p13 = por %p753_p12, %p752_p11 }
  0x1e   :  { %p755_p0 = pnand %p754_p13, %p748_p10 }
  0x20   :  { %758 = shalt.err (!%p755_p0)
}
  0x21   :  { %52 = dma.hbm_to_vmem [thread:$0]  %s1002_s3, 2048, %s47_s14, [#allocation6], %s787_s29, %s787_s29, %s788_s30  }
  0x22   :  { %779 = dma.done.wait [#allocation3], 896  }
  0x23   :  { %780 = vsyncadd [#allocation3], 4294966400 }
  0x24   :  { %781 = dma.done.wait [#allocation6], 4096  }
  0x25   :  { %782 = vsyncadd [#allocation6], 4294963200  ;;  %v790_v0 = vmov 0.0   ;;  %vm791_vm0 = vmmov 0   ;;  %v90_v1 = vld [vmem:[#allocation5 + $0x78] sm:$0xff]  ;;  %v89_v2 = vld [vmem:[#allocation5 + $0x70] sm:$0xff] }
  0x26   :  { %557 = vmatprep.subr.mxu0 %v790_v0  ;;  %589 = vmatprep.mubr.msk.f32.mxu0 %vm791_vm0, %v790_v0  ;;  %v88_v3 = vld [vmem:[#allocation5 + $0x68] sm:$0xff]  ;;  %v87_v4 = vld [vmem:[#allocation5 + $0x60] sm:$0xff]  ;;  %v86_v5 = vld [vmem:[#allocation5 + $0x58] sm:$0xff] }
  0x27   :  { %610 = vmatprep.subr.mxu1 %v790_v0  ;;  %642 = vmatprep.mubr.msk.f32.mxu1 %vm791_vm0, %v790_v0  ;;  %v85_v6 = vld [vmem:[#allocation5 + $0x50] sm:$0xff]  ;;  %v84_v7 = vld [vmem:[#allocation5 + $0x48] sm:$0xff]  ;;  %v83_v8 = vld [vmem:[#allocation5 + $0x40] sm:$0xff] }
  0x28   :  { %558 = vmatpush3.msra.mxu0 %v90_v1  ;;  %v82_v9 = vld [vmem:[#allocation5 + $0x38] sm:$0xff]  ;;  %v81_v10 = vld [vmem:[#allocation5 + $0x30] sm:$0xff]  ;;  %v80_v11 = vld [vmem:[#allocation5 + $0x28] sm:$0xff] }
  0x29   :  { %559 = vmatprep.subr.mxu0 %v790_v0  ;;  %v79_v12 = vld [vmem:[#allocation5 + $0x20] sm:$0xff]  ;;  %v78_v13 = vld [vmem:[#allocation5 + $0x18] sm:$0xff]  ;;  %v77_v14 = vld [vmem:[#allocation5 + $0x10] sm:$0xff] }
  0x2a   :  { %560 = vmatpush3.msra.mxu0 %v89_v2  ;;  %v76_v15 = vld [vmem:[#allocation5 + $0x8] sm:$0xff]  ;;  %v75_v16 = vld [vmem:[#allocation5] sm:$0xff]  ;;  %v877_v18 = vld [vmem:[#allocation2 + $0x8] sm:$0xff] }
  0x2b   :  { %561 = vmatprep.subr.mxu0 %v790_v0  ;;  %v871_v17 = vld [vmem:[#allocation2] sm:$0xff]  ;;  %v882_v19 = vld [vmem:[#allocation2 + $0x10] sm:$0xff]  ;;  %v887_v20 = vld [vmem:[#allocation2 + $0x18] sm:$0xff] }
  0x2c   :  { %562 = vmatpush3.msra.mxu0 %v88_v3  ;;  %v892_v21 = vld [vmem:[#allocation2 + $0x20] sm:$0xff]  ;;  %v897_v22 = vld [vmem:[#allocation2 + $0x28] sm:$0xff]  ;;  %v902_v23 = vld [vmem:[#allocation2 + $0x30] sm:$0xff] }
  0x2d   :  { %563 = vmatprep.subr.mxu0 %v790_v0  ;;  %v507_v24 = vld [vmem:[%s1001_s2] ss:$0 sm:$0xff]  ;;  %v367_v53 = vld [vmem:[#allocation7 + $0x78] sm:$0xff]  ;;  %v366_v54 = vld [vmem:[#allocation7 + $0x70] sm:$0xff] }
  0x2e   :  { %564 = vmatpush3.msra.mxu0 %v87_v4  ;;  %611 = vmatpush3.msra.mxu1 %v367_v53  ;;  %v365_v55 = vld [vmem:[#allocation7 + $0x68] sm:$0xff]  ;;  %v364_v56 = vld [vmem:[#allocation7 + $0x60] sm:$0xff]  ;;  %v363_v57 = vld [vmem:[#allocation7 + $0x58] sm:$0xff] }
  0x2f   :  { %565 = vmatprep.subr.mxu0 %v790_v0  ;;  %612 = vmatprep.subr.mxu1 %v790_v0  ;;  %v362_v58 = vld [vmem:[#allocation7 + $0x50] sm:$0xff]  ;;  %v361_v59 = vld [vmem:[#allocation7 + $0x48] sm:$0xff]  ;;  %v360_v60 = vld [vmem:[#allocation7 + $0x40] sm:$0xff] }
  0x30   :  { %566 = vmatpush3.msra.mxu0 %v86_v5  ;;  %613 = vmatpush3.msra.mxu1 %v366_v54  ;;  %v359_v61 = vld [vmem:[#allocation7 + $0x38] sm:$0xff]  ;;  %v358_v62 = vld [vmem:[#allocation7 + $0x30] sm:$0xff]  ;;  %v357_v63 = vld [vmem:[#allocation7 + $0x28] sm:$0xff] }
  0x31   :  { %567 = vmatprep.subr.mxu0 %v790_v0  ;;  %614 = vmatprep.subr.mxu1 %v790_v0  ;;  %v356_v1 = vld [vmem:[#allocation7 + $0x20] sm:$0xff]  ;;  %v355_v2 = vld [vmem:[#allocation7 + $0x18] sm:$0xff]  ;;  %v354_v3 = vld [vmem:[#allocation7 + $0x10] sm:$0xff] }
  0x32   :  { %568 = vmatpush3.msra.mxu0 %v85_v6  ;;  %615 = vmatpush3.msra.mxu1 %v365_v55  ;;  %v353_v4 = vld [vmem:[#allocation7 + $0x8] sm:$0xff]  ;;  %v352_v5 = vld [vmem:[#allocation7] sm:$0xff] }
  0x33   :  { %569 = vmatprep.subr.mxu0 %v790_v0  ;;  %616 = vmatprep.subr.mxu1 %v790_v0 }
  0x34   :  { %570 = vmatpush3.msra.mxu0 %v84_v7  ;;  %617 = vmatpush3.msra.mxu1 %v364_v56 }
  0x35   :  { %571 = vmatprep.subr.mxu0 %v790_v0  ;;  %618 = vmatprep.subr.mxu1 %v790_v0 }
  0x36   :  { %572 = vmatpush3.msra.mxu0 %v83_v8  ;;  %619 = vmatpush3.msra.mxu1 %v363_v57 }
  0x37   :  { %573 = vmatprep.subr.mxu0 %v790_v0  ;;  %620 = vmatprep.subr.mxu1 %v790_v0 }
  0x38   :  { %574 = vmatpush3.msra.mxu0 %v82_v9  ;;  %621 = vmatpush3.msra.mxu1 %v362_v58 }
  0x39   :  { %575 = vmatprep.subr.mxu0 %v790_v0  ;;  %622 = vmatprep.subr.mxu1 %v790_v0 }
  0x3a   :  { %576 = vmatpush3.msra.mxu0 %v81_v10  ;;  %623 = vmatpush3.msra.mxu1 %v361_v59 }
  0x3b   :  { %577 = vmatprep.subr.mxu0 %v790_v0  ;;  %624 = vmatprep.subr.mxu1 %v790_v0 }
  0x3c   :  { %578 = vmatpush3.msra.mxu0 %v80_v11  ;;  %625 = vmatpush3.msra.mxu1 %v360_v60 }
  0x3d   :  { %579 = vmatprep.subr.mxu0 %v790_v0  ;;  %626 = vmatprep.subr.mxu1 %v790_v0 }
  0x3e   :  { %580 = vmatpush3.msra.mxu0 %v79_v12  ;;  %627 = vmatpush3.msra.mxu1 %v359_v61 }
  0x3f   :  { %581 = vmatprep.subr.mxu0 %v790_v0  ;;  %628 = vmatprep.subr.mxu1 %v790_v0 }
  0x40   :  { %582 = vmatpush3.msra.mxu0 %v78_v13  ;;  %629 = vmatpush3.msra.mxu1 %v358_v62 }
  0x41   :  { %583 = vmatprep.subr.mxu0 %v790_v0  ;;  %630 = vmatprep.subr.mxu1 %v790_v0 }
  0x42   :  { %584 = vmatpush3.msra.mxu0 %v77_v14  ;;  %631 = vmatpush3.msra.mxu1 %v357_v63 }
  0x43   :  { %585 = vmatprep.subr.mxu0 %v790_v0  ;;  %632 = vmatprep.subr.mxu1 %v790_v0 }
  0x44   :  { %586 = vmatpush3.msra.mxu0 %v76_v15  ;;  %633 = vmatpush3.msra.mxu1 %v356_v1 }
  0x45   :  { %587 = vmatprep.subr.mxu0 %v790_v0  ;;  %634 = vmatprep.subr.mxu1 %v790_v0 }
  0x46   :  { %588 = vmatpush3.msra.mxu0 %v75_v16  ;;  %635 = vmatpush3.msra.mxu1 %v355_v2  ;;  %v508_v2 = vld [vmem:[%s1004_s5] ss:$0 sm:$0xff] }
  0x47   :  { %590 = vmatmul.mubr.f32.vlgmr.msra.gmra.mxu0 %v871_v17  ;;  %636 = vmatprep.subr.mxu1 %v790_v0 }
  0x48   :  { %592 = vmatprep.mubr.msk.f32.mxu0 %vm791_vm0, %v790_v0  ;;  %637 = vmatpush3.msra.mxu1 %v354_v3 }
  0x49   :  { %638 = vmatprep.subr.mxu1 %v790_v0 }
  0x4a   :  { %639 = vmatpush3.msra.mxu1 %v353_v4 }
  0x4b   :  { %593 = vmatmul.mubr.f32.gmra.mxu0 %v877_v18  ;;  %640 = vmatprep.subr.mxu1 %v790_v0 }
  0x4c   :  { %595 = vmatprep.mubr.msk.f32.mxu0 %vm791_vm0, %v790_v0  ;;  %641 = vmatpush3.msra.mxu1 %v352_v5 }
  0x4f   :  { %596 = vmatmul.mubr.f32.gmra.mxu0 %v882_v19 }
  0x50   :  { %598 = vmatprep.mubr.msk.f32.mxu0 %vm791_vm0, %v790_v0 }
  0x53   :  { %599 = vmatmul.mubr.f32.gmra.mxu0 %v887_v20 }
  0x54   :  { %601 = vmatprep.mubr.msk.f32.mxu0 %vm791_vm0, %v790_v0 }
  0x57   :  { %602 = vmatmul.mubr.f32.gmra.mxu0 %v892_v21 }
  0x58   :  { %604 = vmatprep.mubr.msk.f32.mxu0 %vm791_vm0, %v790_v0 }
  0x5b   :  { %605 = vmatmul.mubr.f32.gmra.mxu0 %v897_v22 }
  0x5c   :  { %607 = vmatprep.mubr.msk.f32.mxu0 %vm791_vm0, %v790_v0 }
  0x5f   :  { %608 = vmatmul.mubr.f32.gmra.mxu0 %v902_v23 }
 0x107   :  { %v164_v25 = vpop.f32.mrf.mxu0 }
 0x108   :  { %v908_v26 = vadd.f32 %v507_v24, %v164_v25 }
 0x109   :  { %v591_v27 = vpop.f32.mrf.mxu0 }
 0x10a   :  { %198 = vadd.xlane.f32.xlu0 %v908_v26  ;;  %v219_v30 = vmul.f32 %v908_v26, %v908_v26 }
 0x10b   :  { %v169_v28 = vpop.f32.mrf.mxu0 }
 0x10c   :  { %v911_v29 = vadd.f32 %v507_v24, %v169_v28 }
 0x10d   :  { %v594_v31 = vpop.f32.mrf.mxu0 }
 0x10e   :  { %226 = vadd.xlane.f32.xlu0 %v219_v30  ;;  %200 = vadd.xlane.f32.xlu1 %v911_v29  ;;  %v220_v34 = vmul.f32 %v911_v29, %v911_v29 }
 0x10f   :  { %v174_v32 = vpop.f32.mrf.mxu0 }
 0x110   :  { %v916_v33 = vadd.f32 %v507_v24, %v174_v32 }
 0x111   :  { %v597_v35 = vpop.f32.mrf.mxu0 }
 0x112   :  { %228 = vadd.xlane.f32.xlu1 %v220_v34  ;;  %202 = vadd.xlane.f32.xlu0 %v916_v33  ;;  %v221_v36 = vmul.f32 %v916_v33, %v916_v33 }
 0x113   :  { %v179_v37 = vpop.f32.mrf.mxu0 }
 0x114   :  { %v923_v38 = vadd.f32 %v507_v24, %v179_v37 }
 0x115   :  { %v600_v39 = vpop.f32.mrf.mxu0 }
 0x116   :  { %230 = vadd.xlane.f32.xlu1 %v221_v36  ;;  %204 = vadd.xlane.f32.xlu0 %v923_v38  ;;  %v222_v40 = vmul.f32 %v923_v38, %v923_v38 }
 0x117   :  { %v184_v41 = vpop.f32.mrf.mxu0 }
 0x118   :  { %v928_v42 = vadd.f32 %v507_v24, %v184_v41 }
 0x119   :  { %v603_v43 = vpop.f32.mrf.mxu0 }
 0x11a   :  { %232 = vadd.xlane.f32.xlu1 %v222_v40  ;;  %206 = vadd.xlane.f32.xlu0 %v928_v42  ;;  %v223_v44 = vmul.f32 %v928_v42, %v928_v42 }
 0x11b   :  { %v189_v45 = vpop.f32.mrf.mxu0 }
 0x11c   :  { %v933_v46 = vadd.f32 %v507_v24, %v189_v45 }
 0x11d   :  { %v606_v47 = vpop.f32.mrf.mxu0 }
 0x11e   :  { %234 = vadd.xlane.f32.xlu1 %v223_v44  ;;  %208 = vadd.xlane.f32.xlu0 %v933_v46  ;;  %v224_v48 = vmul.f32 %v933_v46, %v933_v46 }
 0x11f   :  { %v194_v49 = vpop.f32.mrf.mxu0 }
 0x120   :  { %v938_v50 = vadd.f32 %v507_v24, %v194_v49 }
 0x121   :  { %v609_v51 = vpop.f32.mrf.mxu0 }
 0x122   :  { %236 = vadd.xlane.f32.xlu1 %v224_v48  ;;  %210 = vadd.xlane.f32.xlu0 %v938_v50  ;;  %v225_v52 = vmul.f32 %v938_v50, %v938_v50 }
 0x126   :  { %238 = vadd.xlane.f32.xlu1 %v225_v52 }
 0x193   :  { %v199_v6 = vpop.xlane.xlu0 %198 }
 0x194   :  { %v212_v7 = vmul.f32 0.0078125, %v199_v6 }
 0x196   :  { %v247_v10 = vmul.f32 %v212_v7, %v212_v7  ;;  %v261_v55 = vsub.f32 %v908_v26, %v212_v7  ;;  %v509_v26 = vld [vmem:[%s1005_s6] ss:$0 sm:$0xff] }
 0x197   :  { %v227_v8 = vpop.xlane.xlu0 %226  ;;  %v201_v9 = vpop.xlane.xlu1 %200 }
 0x198   :  { %v240_v11 = vmul.f32 0.0078125, %v227_v8  ;;  %v213_v12 = vmul.f32 0.0078125, %v201_v9 }
 0x19a   :  { %v254_v13 = vsub.f32 %v240_v11, %v247_v10  ;;  %v248_v24 = vmul.f32 %v213_v12, %v213_v12  ;;  %v262_v3 = vsub.f32 %v911_v29, %v213_v12 }
 0x19b   :  { %v229_v14 = vpop.xlane.xlu1 %228  ;;  %v203_v15 = vpop.xlane.xlu0 %202 }
 0x19c   :  { %v268_v16 = vadd.f32 1e-05, %v254_v13  ;;  %v241_v25 = vmul.f32 0.0078125, %v229_v14  ;;  %v214_v27 = vmul.f32 0.0078125, %v203_v15 }
 0x19e   :  { %671 = vrsqrt.f32 %v268_v16  ;;  %v255_v28 = vsub.f32 %v241_v25, %v248_v24  ;;  %v249_v30 = vmul.f32 %v214_v27, %v214_v27  ;;  %v263_v14 = vsub.f32 %v916_v33, %v214_v27 }
 0x19f   :  { %v231_v31 = vpop.xlane.xlu1 %230  ;;  %v205_v32 = vpop.xlane.xlu0 %204 }
 0x1a0   :  { %v269_v34 = vadd.f32 1e-05, %v255_v28  ;;  %v242_v35 = vmul.f32 0.0078125, %v231_v31  ;;  %v215_v36 = vmul.f32 0.0078125, %v205_v32 }
 0x1a2   :  { %673 = vrsqrt.f32 %v269_v34  ;;  %v256_v37 = vsub.f32 %v242_v35, %v249_v30  ;;  %v250_v39 = vmul.f32 %v215_v36, %v215_v36  ;;  %v264_v30 = vsub.f32 %v923_v38, %v215_v36 }
 0x1a3   :  { %v233_v40 = vpop.xlane.xlu1 %232  ;;  %v207_v41 = vpop.xlane.xlu0 %206 }
 0x1a4   :  { %v270_v43 = vadd.f32 1e-05, %v256_v37  ;;  %v243_v44 = vmul.f32 0.0078125, %v233_v40  ;;  %v216_v45 = vmul.f32 0.0078125, %v207_v41 }
 0x1a6   :  { %675 = vrsqrt.f32 %v270_v43  ;;  %v257_v47 = vsub.f32 %v243_v44, %v250_v39  ;;  %v251_v48 = vmul.f32 %v216_v45, %v216_v45  ;;  %v265_v33 = vsub.f32 %v928_v42, %v216_v45 }
 0x1a7   :  { %v235_v49 = vpop.xlane.xlu1 %234  ;;  %v209_v51 = vpop.xlane.xlu0 %208 }
 0x1a8   :  { %v271_v52 = vadd.f32 1e-05, %v257_v47  ;;  %v244_v53 = vmul.f32 0.0078125, %v235_v49  ;;  %v217_v54 = vmul.f32 0.0078125, %v209_v51 }
 0x1aa   :  { %677 = vrsqrt.f32 %v271_v52  ;;  %v258_v56 = vsub.f32 %v244_v53, %v251_v48  ;;  %v252_v57 = vmul.f32 %v217_v54, %v217_v54  ;;  %v266_v44 = vsub.f32 %v933_v46, %v217_v54 }
 0x1ab   :  { %v672_v58 = vpop.eup %671  ;;  %v237_v59 = vpop.xlane.xlu1 %236 }
 0x1ac   :  { %v211_v60 = vpop.xlane.xlu0 %210  ;;  %v272_v61 = vadd.f32 1e-05, %v258_v56  ;;  %v245_v62 = vmul.f32 0.0078125, %v237_v59  ;;  %v282_v1 = vmul.f32 %v672_v58, %v261_v55 }
 0x1ad   :  { %v218_v63 = vmul.f32 0.0078125, %v211_v60 }
 0x1ae   :  { %679 = vrsqrt.f32 %v272_v61  ;;  %v259_v4 = vsub.f32 %v245_v62, %v252_v57  ;;  %v296_v8 = vmul.f32 %v508_v2, %v282_v1 }
 0x1af   :  { %v253_v5 = vmul.f32 %v218_v63, %v218_v63  ;;  %v674_v6 = vpop.eup %673  ;;  %v239_v7 = vpop.xlane.xlu1 %238  ;;  %v267_v52 = vsub.f32 %v938_v50, %v218_v63 }
 0x1b0   :  { %v273_v9 = vadd.f32 1e-05, %v259_v4  ;;  %v246_v10 = vmul.f32 0.0078125, %v239_v7  ;;  %v283_v11 = vmul.f32 %v674_v6, %v262_v3  ;;  %v310_v13 = vadd.f32 %v509_v26, %v296_v8 }
 0x1b2   :  { %681 = vrsqrt.f32 %v273_v9  ;;  %v260_v15 = vsub.f32 %v246_v10, %v253_v5  ;;  %v297_v16 = vmul.f32 %v508_v2, %v283_v11  ;;  %v317_v12 = vmul.f32 0.5, %v310_v13 }
 0x1b3   :  { %v676_v29 = vpop.eup %675 }
 0x1b4   :  { %v274_v24 = vadd.f32 1e-05, %v260_v15  ;;  %v311_v25 = vadd.f32 %v509_v26, %v297_v16  ;;  %v284_v28 = vmul.f32 %v676_v29, %v263_v14  ;;  %683 = vtanh.f32 %v317_v12 }
 0x1b6   :  { %685 = vrsqrt.f32 %v274_v24  ;;  %v318_v31 = vmul.f32 0.5, %v311_v25  ;;  %v298_v32 = vmul.f32 %v508_v2, %v284_v28 }
 0x1b7   :  { %v678_v34 = vpop.eup %677 }
 0x1b8   :  { %687 = vtanh.f32 %v318_v31  ;;  %v312_v35 = vadd.f32 %v509_v26, %v298_v32  ;;  %v285_v37 = vmul.f32 %v678_v34, %v264_v30  ;;  %v510_v30 = vld [vmem:[%s1003_s4] ss:$0 sm:$0xff]  ;;  %s792_s4 = smov [#allocation8]  }
 0x1b9   :  { %s494_s20 = sshll.u32 %s792_s4, 4  ;;  %s495_s20 = int_to_ptr.vmem [resolvable:$true] %s494_s20 }
 0x1ba   :  { %v319_v27 = vmul.f32 0.5, %v312_v35  ;;  %v299_v39 = vmul.f32 %v508_v2, %v285_v37  ;;  %s759_s21 = scalar_lea.vmem %s495_s20, 896  ;;  %p764_p2 = scmp.lt.s32.totalorder %s495_s20, %s495_s20 }
 0x1bb   :  { %v680_v40 = vpop.eup %679  ;;  %p760_p1 = scmp.ne.s32.totalorder %s495_s20, %s759_s21  ;;  %p765_p3 = scmp.lt.s32.totalorder %s759_s21, %s759_s21 }
 0x1bc   :  { %689 = vtanh.f32 %v319_v27  ;;  %v313_v41 = vadd.f32 %v509_v26, %v299_v39  ;;  %v286_v43 = vmul.f32 %v680_v40, %v265_v33 }
 0x1bd   :  { %p766_p4 = por %p765_p3, %p764_p2 }
 0x1be   :  { %v320_v47 = vmul.f32 0.5, %v313_v41  ;;  %v300_v48 = vmul.f32 %v508_v2, %v286_v43 }
 0x1bf   :  { %v682_v38 = vpop.eup %681  ;;  %p767_p5 = pnand %p766_p4, %p760_p1 }
 0x1c0   :  { %691 = vtanh.f32 %v320_v47  ;;  %v314_v36 = vadd.f32 %v509_v26, %v300_v48  ;;  %v287_v49 = vmul.f32 %v682_v38, %v266_v44 }
 0x1c1   :  { %v684_v51 = vpop.eup %683 }
 0x1c2   :  { %v321_v53 = vmul.f32 0.5, %v314_v36  ;;  %v301_v55 = vmul.f32 %v508_v2, %v287_v49  ;;  %v331_v45 = vmul.f32 0.5, %v684_v51 }
 0x1c3   :  { %v686_v42 = vpop.eup %685 }
 0x1c4   :  { %693 = vtanh.f32 %v321_v53  ;;  %v315_v56 = vadd.f32 %v509_v26, %v301_v55  ;;  %v288_v57 = vmul.f32 %v686_v42, %v267_v52  ;;  %v338_v59 = vadd.f32 0.5, %v331_v45 }
 0x1c5   :  { %v688_v58 = vpop.eup %687 }
 0x1c6   :  { %v332_v60 = vmul.f32 0.5, %v688_v58  ;;  %v322_v46 = vmul.f32 0.5, %v315_v56  ;;  %v302_v54 = vmul.f32 %v508_v2, %v288_v57  ;;  %v345_v61 = vmul.f32 %v338_v59, %v310_v13 }
 0x1c8   :  { %v339_v62 = vadd.f32 0.5, %v332_v60  ;;  %695 = vtanh.f32 %v322_v46  ;;  %v316_v1 = vadd.f32 %v509_v26, %v302_v54  ;;  %643 = vmatmul.mubr.f32.vlgmr.msra.gmra.mxu1 %v345_v61 }
 0x1c9   :  { %v690_v3 = vpop.eup %689  ;;  %645 = vmatprep.mubr.msk.f32.mxu1 %vm791_vm0, %v790_v0 }
 0x1ca   :  { %v346_v50 = vmul.f32 %v339_v62, %v311_v25  ;;  %v333_v63 = vmul.f32 0.5, %v690_v3  ;;  %v323_v4 = vmul.f32 0.5, %v316_v1 }
 0x1cc   :  { %v340_v5 = vadd.f32 0.5, %v333_v63  ;;  %697 = vtanh.f32 %v323_v4  ;;  %646 = vmatmul.mubr.f32.gmra.mxu1 %v346_v50 }
 0x1cd   :  { %v692_v6 = vpop.eup %691  ;;  %648 = vmatprep.mubr.msk.f32.mxu1 %vm791_vm0, %v790_v0 }
 0x1ce   :  { %v347_v2 = vmul.f32 %v340_v5, %v312_v35  ;;  %v334_v7 = vmul.f32 0.5, %v692_v6 }
 0x1d0   :  { %v341_v8 = vadd.f32 0.5, %v334_v7  ;;  %649 = vmatmul.mubr.f32.gmra.mxu1 %v347_v2 }
 0x1d1   :  { %v694_v9 = vpop.eup %693  ;;  %651 = vmatprep.mubr.msk.f32.mxu1 %vm791_vm0, %v790_v0 }
 0x1d2   :  { %v348_v26 = vmul.f32 %v341_v8, %v313_v41  ;;  %v335_v10 = vmul.f32 0.5, %v694_v9 }
 0x1d4   :  { %v342_v11 = vadd.f32 0.5, %v335_v10  ;;  %652 = vmatmul.mubr.f32.gmra.mxu1 %v348_v26 }
 0x1d5   :  { %v696_v13 = vpop.eup %695  ;;  %654 = vmatprep.mubr.msk.f32.mxu1 %vm791_vm0, %v790_v0 }
 0x1d6   :  { %v349_v14 = vmul.f32 %v342_v11, %v314_v36  ;;  %v336_v15 = vmul.f32 0.5, %v696_v13 }
 0x1d8   :  { %v343_v16 = vadd.f32 0.5, %v336_v15  ;;  %655 = vmatmul.mubr.f32.gmra.mxu1 %v349_v14 }
 0x1d9   :  { %v698_v29 = vpop.eup %697  ;;  %657 = vmatprep.mubr.msk.f32.mxu1 %vm791_vm0, %v790_v0 }
 0x1da   :  { %v350_v12 = vmul.f32 %v343_v16, %v315_v56  ;;  %v337_v24 = vmul.f32 0.5, %v698_v29 }
 0x1dc   :  { %v344_v25 = vadd.f32 0.5, %v337_v24  ;;  %658 = vmatmul.mubr.f32.gmra.mxu1 %v350_v12 }
 0x1dd   :  { %660 = vmatprep.mubr.msk.f32.mxu1 %vm791_vm0, %v790_v0 }
 0x1de   :  { %v351_v28 = vmul.f32 %v344_v25, %v316_v1 }
 0x1e0   :  { %661 = vmatmul.mubr.f32.gmra.mxu1 %v351_v28 }
 0x288   :  { %v441_v31 = vpop.f32.mrf.mxu1 }
 0x289   :  { %v442_v32 = vadd.f32 %v510_v30, %v441_v31 }
 0x28a   :  { %v644_v34 = vpop.f32.mrf.mxu1 }
 0x28b   :  { %v475_v35 = vadd.f32 %v442_v32, %v871_v17 }
 0x28c   :  { %v446_v37 = vpop.f32.mrf.mxu1 }
 0x28d   :  { %482 = vst [vmem:[#allocation8] sm:$0xff] %v475_v35  ;;  %v447_v33 = vadd.f32 %v510_v30, %v446_v37 }
 0x28e   :  { %v647_v27 = vpop.f32.mrf.mxu1 }
 0x28f   :  { %v476_v39 = vadd.f32 %v447_v33, %v877_v18 }
 0x290   :  { %v451_v40 = vpop.f32.mrf.mxu1 }
 0x291   :  { %483 = vst [vmem:[#allocation8 + $0x8] sm:$0xff] %v476_v39  ;;  %v452_v0 = vadd.f32 %v510_v30, %v451_v40 }
 0x292   :  { %v650_v41 = vpop.f32.mrf.mxu1 }
 0x293   :  { %v477_v43 = vadd.f32 %v452_v0, %v882_v19 }
 0x294   :  { %v456_v44 = vpop.f32.mrf.mxu1 }
 0x295   :  { %484 = vst [vmem:[#allocation8 + $0x10] sm:$0xff] %v477_v43  ;;  %v457_v47 = vadd.f32 %v510_v30, %v456_v44 }
 0x296   :  { %v653_v48 = vpop.f32.mrf.mxu1 }
 0x297   :  { %v478_v38 = vadd.f32 %v457_v47, %v887_v20 }
 0x298   :  { %v461_v36 = vpop.f32.mrf.mxu1 }
 0x299   :  { %485 = vst [vmem:[#allocation8 + $0x18] sm:$0xff] %v478_v38  ;;  %v462_v17 = vadd.f32 %v510_v30, %v461_v36 }
 0x29a   :  { %v656_v49 = vpop.f32.mrf.mxu1 }
 0x29b   :  { %v479_v51 = vadd.f32 %v462_v17, %v892_v21 }
 0x29c   :  { %v466_v52 = vpop.f32.mrf.mxu1 }
 0x29d   :  { %486 = vst [vmem:[#allocation8 + $0x20] sm:$0xff] %v479_v51  ;;  %v467_v18 = vadd.f32 %v510_v30, %v466_v52 }
 0x29e   :  { %v659_v53 = vpop.f32.mrf.mxu1 }
 0x29f   :  { %v480_v55 = vadd.f32 %v467_v18, %v897_v22 }
 0x2a0   :  { %v471_v42 = vpop.f32.mrf.mxu1 }
 0x2a1   :  { %487 = vst [vmem:[#allocation8 + $0x28] sm:$0xff] %v480_v55  ;;  %v472_v19 = vadd.f32 %v510_v30, %v471_v42 }
 0x2a2   :  { %v662_v45 = vpop.f32.mrf.mxu1 }
 0x2a3   :  { %v481_v20 = vadd.f32 %v472_v19, %v902_v23 }
 0x2a5   :  { %488 = vst [vmem:[#allocation8 + $0x30] sm:$0xff] %v481_v20 }
 0x2a6   :  { %770 = shalt.err (!%p767_p5)
}
 0x2a7   :  { %500 = dma.vmem_to_hbm [thread:$0]  %s495_s20, 896, %s1006_s7, [#allocation4], %s787_s29, %s787_s29, %s788_s30  }
 0x2a8   :  { %783 = dma.done.wait [#allocation4], 896  }
 0x2a9   :  { %784 = vsyncadd [#allocation4], 4294966400 }
 0x2aa   :  { %504 = vsyncpa [#allocation3], 1 }
 0x2ab   :  { %505 = vsyncpa [#allocation6], 1 }
 0x2ac   :  { %506 = vsyncpa [#allocation4], 1 }

</bundles_post_ra>
